<compile_context>
chip_gen: v7x
topology: tpu7x:2x2x1
jax: 0.10.0
libtpu: 0.0.40
codegen_flags: <defaults>
</compile_context>

<pallas_src>
import jax
import jax.numpy as jnp
from jax import lax
from jax.experimental import pallas as pl
from jax.experimental.pallas import tpu as pltpu
import numpy as np


def lstm_head_kernel(x_ref, w_ih_ref, w_hh_ref, b_ref, w_out_ref, b_out_ref,
                     out_ref):
    """LSTM recurrence over time + output Linear, in one kernel call.

    x_ref    : (T*B, I)  time-major input (row = t*B + b)
    w_ih_ref : (I, 4H)   input->gates weights, gate order (i, f, o, g)
    w_hh_ref : (H, 4H)   hidden->gates weights, gate order (i, f, o, g)
    b_ref    : (1, 4H)   combined bias (b_ih + b_hh), same gate order
    w_out_ref: (H, 2)    final linear weights
    b_out_ref: (1, 2)    final linear bias
    out_ref  : (B, 2)    output
    """
    B = out_ref.shape[0]
    H = w_hh_ref.shape[0]
    T = x_ref.shape[0] // B
    G = 4 * H

    # --- Hoisted input projection: one MXU call for all timesteps, bias folded.
    xg = (jnp.dot(x_ref[...], w_ih_ref[...],
                  preferred_element_type=jnp.float32)
          + b_ref[...])                                    # (T*B, 4H)

    # --- Hidden->gates projection (all setup hoisted out of the time loop).
    w_hh = w_hh_ref[...]                                   # (H, 4H)
    if H <= 8:
        # Tiny-H path: H rank-1 broadcast FMAs on the VPU. Row broadcasts are
        # hoisted (done once), only the per-step h lane-extracts remain.
        w_hh_bcast = [jnp.broadcast_to(w_hh[j:j + 1, :], (B, G))
                      for j in range(H)]                   # each (B, 4H)

        def hidden_proj(h):
            acc = h[:, 0:1] * w_hh_bcast[0]
            for j in range(1, H):
                acc = acc + h[:, j:j + 1] * w_hh_bcast[j]
            return acc
    else:
        def hidden_proj(h):
            return jnp.dot(h, w_hh, preferred_element_type=jnp.float32)

    # --- Recurrence: h/c carried as register values, loop fully unrolled.
    h = jnp.zeros((B, H), jnp.float32)
    c = jnp.zeros((B, H), jnp.float32)
    for t in range(T):
        xg_t = xg[t * B:(t + 1) * B, :]                    # contiguous slice
        gates = xg_t + hidden_proj(h)                      # (B, 4H)
        # Gate order after wrapper permutation: [i | f | o | g].
        s = jax.nn.sigmoid(gates[:, 0:3 * H])              # i, f, o lanes
        g = jnp.tanh(gates[:, 3 * H:4 * H])                # g lanes
        c = s[:, H:2 * H] * c + s[:, 0:H] * g
        h = s[:, 2 * H:3 * H] * jnp.tanh(c)

    # --- Final linear on h_n[-1] (last hidden state of the single layer).
    out_ref[...] = (jnp.dot(h, w_out_ref[...],
                            preferred_element_type=jnp.float32)
                    + b_out_ref[...])


def nnet_forward(x_btI, params):
    """x_btI: (B, T, I) batch_first, like the PyTorch module."""
    w_ih, w_hh, b, w_out, b_out = params   # PyTorch gate order (i, f, g, o)
    B, T, I = x_btI.shape
    H = w_hh.shape[0]

    # Time-major flatten: row = t*B + b -> per-step gate fetch is contiguous.
    x_flat = jnp.swapaxes(x_btI, 0, 1).reshape(T * B, I)

    # Permute gate columns (i, f, g, o) -> (i, f, o, g) once, outside the
    # kernel, so sigmoid/tanh lanes are each contiguous inside the kernel.
    perm = np.concatenate([np.arange(0, 2 * H),
                           np.arange(3 * H, 4 * H),
                           np.arange(2 * H, 3 * H)])
    w_ih_p = w_ih[:, perm]
    w_hh_p = w_hh[:, perm]
    b_p = b[:, perm]

    vmem = pl.BlockSpec(memory_space=pltpu.MemorySpace.VMEM)
    return pl.pallas_call(
        lstm_head_kernel,
        out_shape=jax.ShapeDtypeStruct((B, 2), jnp.float32),
        in_specs=[vmem] * 6,
        out_specs=vmem,
    )(x_flat, w_ih_p, w_hh_p, b_p, w_out, b_out)


def init_params(key, input_size, hidden_dim):
    """Deterministic init mimicking PyTorch's U(-1/sqrt(H), 1/sqrt(H))."""
    k = 1.0 / np.sqrt(hidden_dim)
    keys = jax.random.split(key, 6)
    # PyTorch stores weight_ih as (4H, I); we keep the transposed (I, 4H).
    w_ih = jax.random.uniform(keys[0], (input_size, 4 * hidden_dim),
                              minval=-k, maxval=k, dtype=jnp.float32)
    w_hh = jax.random.uniform(keys[1], (hidden_dim, 4 * hidden_dim),
                              minval=-k, maxval=k, dtype=jnp.float32)
    b_ih = jax.random.uniform(keys[2], (4 * hidden_dim,),
                              minval=-k, maxval=k, dtype=jnp.float32)
    b_hh = jax.random.uniform(keys[3], (4 * hidden_dim,),
                              minval=-k, maxval=k, dtype=jnp.float32)
    b = (b_ih + b_hh).reshape(1, 4 * hidden_dim)
    kl = 1.0 / np.sqrt(hidden_dim)
    w_out = jax.random.uniform(keys[4], (hidden_dim, 2),
                               minval=-kl, maxval=kl, dtype=jnp.float32)
    b_out = jax.random.uniform(keys[5], (1, 2),
                               minval=-kl, maxval=kl, dtype=jnp.float32)
    return w_ih, w_hh, b, w_out, b_out


def nnet_reference(x_btI, params):
    """Pure-JAX reference (PyTorch gate order i, f, g, o) for correctness."""
    w_ih, w_hh, b, w_out, b_out = params
    B = x_btI.shape[0]
    H = w_hh.shape[0]
    h = jnp.zeros((B, H), jnp.float32)
    c = jnp.zeros((B, H), jnp.float32)

    def step(carry, x_t):
        h, c = carry
        gates = x_t @ w_ih + h @ w_hh + b
        i = jax.nn.sigmoid(gates[:, 0 * H:1 * H])
        f = jax.nn.sigmoid(gates[:, 1 * H:2 * H])
        g = jnp.tanh(gates[:, 2 * H:3 * H])
        o = jax.nn.sigmoid(gates[:, 3 * H:4 * H])
        c = f * c + i * g
        h = o * jnp.tanh(c)
        return (h, c), None

    (h, _), _ = lax.scan(step, (h, c), jnp.transpose(x_btI, (1, 0, 2)))
    return h @ w_out + b_out


if __name__ == "__main__":
    B, T, I, H = 2, 8, 16, 4   # batch, seq, input_size, hidden_dim (default 4)

    key = jax.random.PRNGKey(0)
    kx, kp = jax.random.split(key)
    x = jax.random.normal(kx, (B, T, I), dtype=jnp.float32)
    params = init_params(kp, I, H)

    out = nnet_forward(x, params)
    out = jax.block_until_ready(out)

    ref = nnet_reference(x, params)
    np.testing.assert_allclose(np.asarray(out), np.asarray(ref),
                               rtol=1e-5, atol=1e-5)
    assert out.shape == (B, 2)
    print("KERNEL_OK")
</pallas_src>

<mosaic_0001>
module attributes {stable_mosaic.version = 11 : i64} {
  func.func @lstm_head_kernel(%arg0: memref<16x16xf32, #tpu.memory_space<vmem>>, %arg1: memref<16x16xf32, #tpu.memory_space<vmem>>, %arg2: memref<4x16xf32, #tpu.memory_space<vmem>>, %arg3: memref<1x16xf32, #tpu.memory_space<vmem>>, %arg4: memref<4x2xf32, #tpu.memory_space<vmem>>, %arg5: memref<1x2xf32, #tpu.memory_space<vmem>>, %arg6: memref<2x2xf32, #tpu.memory_space<vmem>>) attributes {dimension_semantics = [], scalar_prefetch = 0 : i64, scratch_operands = 0 : i64, tpu.core_type = #tpu.core_type<tc>} {
    %c0 = arith.constant 0 : index
    %c0_0 = arith.constant 0 : index
    %0 = vector.load %arg0[%c0, %c0_0] : memref<16x16xf32, #tpu.memory_space<vmem>>, vector<16x16xf32>
    %c0_1 = arith.constant 0 : index
    %c0_2 = arith.constant 0 : index
    %1 = vector.load %arg1[%c0_1, %c0_2] : memref<16x16xf32, #tpu.memory_space<vmem>>, vector<16x16xf32>
    %cst = arith.constant dense<0.000000e+00> : vector<16x16xf32>
    %2 = tpu.matmul %0, %1, %cst {dimension_numbers = #tpu.dot_dimension_numbers<[1], [0], [0], [1], [0, 0, 1, 1], [], []>} : vector<16x16xf32>, vector<16x16xf32>, vector<16x16xf32> -> vector<16x16xf32>
    %c0_3 = arith.constant 0 : index
    %c0_4 = arith.constant 0 : index
    %3 = vector.load %arg3[%c0_3, %c0_4] : memref<1x16xf32, #tpu.memory_space<vmem>>, vector<1x16xf32>
    %4 = vector.broadcast %3 : vector<1x16xf32> to vector<16x16xf32>
    %5 = arith.addf %2, %4 : vector<16x16xf32>
    %c0_5 = arith.constant 0 : index
    %c0_6 = arith.constant 0 : index
    %6 = vector.load %arg2[%c0_5, %c0_6] : memref<4x16xf32, #tpu.memory_space<vmem>>, vector<4x16xf32>
    %7 = vector.extract_strided_slice %6 {offsets = [0, 0], sizes = [1, 16], strides = [1, 1]} : vector<4x16xf32> to vector<1x16xf32>
    %8 = vector.shape_cast %7 : vector<1x16xf32> to vector<1x16xf32>
    %9 = vector.broadcast %8 : vector<1x16xf32> to vector<2x16xf32>
    %10 = vector.extract_strided_slice %6 {offsets = [1, 0], sizes = [1, 16], strides = [1, 1]} : vector<4x16xf32> to vector<1x16xf32>
    %11 = vector.shape_cast %10 : vector<1x16xf32> to vector<1x16xf32>
    %12 = vector.broadcast %11 : vector<1x16xf32> to vector<2x16xf32>
    %13 = vector.extract_strided_slice %6 {offsets = [2, 0], sizes = [1, 16], strides = [1, 1]} : vector<4x16xf32> to vector<1x16xf32>
    %14 = vector.shape_cast %13 : vector<1x16xf32> to vector<1x16xf32>
    %15 = vector.broadcast %14 : vector<1x16xf32> to vector<2x16xf32>
    %16 = vector.extract_strided_slice %6 {offsets = [3, 0], sizes = [1, 16], strides = [1, 1]} : vector<4x16xf32> to vector<1x16xf32>
    %17 = vector.shape_cast %16 : vector<1x16xf32> to vector<1x16xf32>
    %18 = vector.broadcast %17 : vector<1x16xf32> to vector<2x16xf32>
    %cst_7 = arith.constant 0.000000e+00 : f32
    %19 = vector.broadcast %cst_7 : f32 to vector<2x4xf32>
    %cst_8 = arith.constant 0.000000e+00 : f32
    %20 = vector.broadcast %cst_8 : f32 to vector<2x4xf32>
    %21 = vector.extract_strided_slice %5 {offsets = [0, 0], sizes = [2, 16], strides = [1, 1]} : vector<16x16xf32> to vector<2x16xf32>
    %22 = vector.extract_strided_slice %19 {offsets = [0, 0], sizes = [2, 1], strides = [1, 1]} : vector<2x4xf32> to vector<2x1xf32>
    %23 = vector.broadcast %22 : vector<2x1xf32> to vector<2x16xf32>
    %24 = arith.mulf %23, %9 : vector<2x16xf32>
    %25 = vector.extract_strided_slice %19 {offsets = [0, 1], sizes = [2, 1], strides = [1, 1]} : vector<2x4xf32> to vector<2x1xf32>
    %26 = vector.broadcast %25 : vector<2x1xf32> to vector<2x16xf32>
    %27 = arith.mulf %26, %12 : vector<2x16xf32>
    %28 = arith.addf %24, %27 : vector<2x16xf32>
    %29 = vector.extract_strided_slice %19 {offsets = [0, 2], sizes = [2, 1], strides = [1, 1]} : vector<2x4xf32> to vector<2x1xf32>
    %30 = vector.broadcast %29 : vector<2x1xf32> to vector<2x16xf32>
    %31 = arith.mulf %30, %15 : vector<2x16xf32>
    %32 = arith.addf %28, %31 : vector<2x16xf32>
    %33 = vector.extract_strided_slice %19 {offsets = [0, 3], sizes = [2, 1], strides = [1, 1]} : vector<2x4xf32> to vector<2x1xf32>
    %34 = vector.broadcast %33 : vector<2x1xf32> to vector<2x16xf32>
    %35 = arith.mulf %34, %18 : vector<2x16xf32>
    %36 = arith.addf %32, %35 : vector<2x16xf32>
    %37 = arith.addf %21, %36 : vector<2x16xf32>
    %38 = vector.extract_strided_slice %37 {offsets = [0, 0], sizes = [2, 12], strides = [1, 1]} : vector<2x16xf32> to vector<2x12xf32>
    %39 = arith.negf %38 : vector<2x12xf32>
    %40 = math.exp %39 : vector<2x12xf32>
    %cst_9 = arith.constant 1.000000e+00 : f32
    %41 = vector.broadcast %cst_9 : f32 to vector<2x12xf32>
    %42 = arith.addf %41, %40 : vector<2x12xf32>
    %43 = arith.divf %41, %42 : vector<2x12xf32>
    %44 = vector.extract_strided_slice %37 {offsets = [0, 12], sizes = [2, 4], strides = [1, 1]} : vector<2x16xf32> to vector<2x4xf32>
    %45 = math.tanh %44 : vector<2x4xf32>
    %46 = vector.extract_strided_slice %43 {offsets = [0, 4], sizes = [2, 4], strides = [1, 1]} : vector<2x12xf32> to vector<2x4xf32>
    %47 = arith.mulf %46, %20 : vector<2x4xf32>
    %48 = vector.extract_strided_slice %43 {offsets = [0, 0], sizes = [2, 4], strides = [1, 1]} : vector<2x12xf32> to vector<2x4xf32>
    %49 = arith.mulf %48, %45 : vector<2x4xf32>
    %50 = arith.addf %47, %49 : vector<2x4xf32>
    %51 = vector.extract_strided_slice %43 {offsets = [0, 8], sizes = [2, 4], strides = [1, 1]} : vector<2x12xf32> to vector<2x4xf32>
    %52 = math.tanh %50 : vector<2x4xf32>
    %53 = arith.mulf %51, %52 : vector<2x4xf32>
    %54 = vector.extract_strided_slice %5 {offsets = [2, 0], sizes = [2, 16], strides = [1, 1]} : vector<16x16xf32> to vector<2x16xf32>
    %55 = vector.extract_strided_slice %53 {offsets = [0, 0], sizes = [2, 1], strides = [1, 1]} : vector<2x4xf32> to vector<2x1xf32>
    %56 = vector.broadcast %55 : vector<2x1xf32> to vector<2x16xf32>
    %57 = arith.mulf %56, %9 : vector<2x16xf32>
    %58 = vector.extract_strided_slice %53 {offsets = [0, 1], sizes = [2, 1], strides = [1, 1]} : vector<2x4xf32> to vector<2x1xf32>
    %59 = vector.broadcast %58 : vector<2x1xf32> to vector<2x16xf32>
    %60 = arith.mulf %59, %12 : vector<2x16xf32>
    %61 = arith.addf %57, %60 : vector<2x16xf32>
    %62 = vector.extract_strided_slice %53 {offsets = [0, 2], sizes = [2, 1], strides = [1, 1]} : vector<2x4xf32> to vector<2x1xf32>
    %63 = vector.broadcast %62 : vector<2x1xf32> to vector<2x16xf32>
    %64 = arith.mulf %63, %15 : vector<2x16xf32>
    %65 = arith.addf %61, %64 : vector<2x16xf32>
    %66 = vector.extract_strided_slice %53 {offsets = [0, 3], sizes = [2, 1], strides = [1, 1]} : vector<2x4xf32> to vector<2x1xf32>
    %67 = vector.broadcast %66 : vector<2x1xf32> to vector<2x16xf32>
    %68 = arith.mulf %67, %18 : vector<2x16xf32>
    %69 = arith.addf %65, %68 : vector<2x16xf32>
    %70 = arith.addf %54, %69 : vector<2x16xf32>
    %71 = vector.extract_strided_slice %70 {offsets = [0, 0], sizes = [2, 12], strides = [1, 1]} : vector<2x16xf32> to vector<2x12xf32>
    %72 = arith.negf %71 : vector<2x12xf32>
    %73 = math.exp %72 : vector<2x12xf32>
    %cst_10 = arith.constant 1.000000e+00 : f32
    %74 = vector.broadcast %cst_10 : f32 to vector<2x12xf32>
    %75 = arith.addf %74, %73 : vector<2x12xf32>
    %76 = arith.divf %74, %75 : vector<2x12xf32>
    %77 = vector.extract_strided_slice %70 {offsets = [0, 12], sizes = [2, 4], strides = [1, 1]} : vector<2x16xf32> to vector<2x4xf32>
    %78 = math.tanh %77 : vector<2x4xf32>
    %79 = vector.extract_strided_slice %76 {offsets = [0, 4], sizes = [2, 4], strides = [1, 1]} : vector<2x12xf32> to vector<2x4xf32>
    %80 = arith.mulf %79, %50 : vector<2x4xf32>
    %81 = vector.extract_strided_slice %76 {offsets = [0, 0], sizes = [2, 4], strides = [1, 1]} : vector<2x12xf32> to vector<2x4xf32>
    %82 = arith.mulf %81, %78 : vector<2x4xf32>
    %83 = arith.addf %80, %82 : vector<2x4xf32>
    %84 = vector.extract_strided_slice %76 {offsets = [0, 8], sizes = [2, 4], strides = [1, 1]} : vector<2x12xf32> to vector<2x4xf32>
    %85 = math.tanh %83 : vector<2x4xf32>
    %86 = arith.mulf %84, %85 : vector<2x4xf32>
    %87 = vector.extract_strided_slice %5 {offsets = [4, 0], sizes = [2, 16], strides = [1, 1]} : vector<16x16xf32> to vector<2x16xf32>
    %88 = vector.extract_strided_slice %86 {offsets = [0, 0], sizes = [2, 1], strides = [1, 1]} : vector<2x4xf32> to vector<2x1xf32>
    %89 = vector.broadcast %88 : vector<2x1xf32> to vector<2x16xf32>
    %90 = arith.mulf %89, %9 : vector<2x16xf32>
    %91 = vector.extract_strided_slice %86 {offsets = [0, 1], sizes = [2, 1], strides = [1, 1]} : vector<2x4xf32> to vector<2x1xf32>
    %92 = vector.broadcast %91 : vector<2x1xf32> to vector<2x16xf32>
    %93 = arith.mulf %92, %12 : vector<2x16xf32>
    %94 = arith.addf %90, %93 : vector<2x16xf32>
    %95 = vector.extract_strided_slice %86 {offsets = [0, 2], sizes = [2, 1], strides = [1, 1]} : vector<2x4xf32> to vector<2x1xf32>
    %96 = vector.broadcast %95 : vector<2x1xf32> to vector<2x16xf32>
    %97 = arith.mulf %96, %15 : vector<2x16xf32>
    %98 = arith.addf %94, %97 : vector<2x16xf32>
    %99 = vector.extract_strided_slice %86 {offsets = [0, 3], sizes = [2, 1], strides = [1, 1]} : vector<2x4xf32> to vector<2x1xf32>
    %100 = vector.broadcast %99 : vector<2x1xf32> to vector<2x16xf32>
    %101 = arith.mulf %100, %18 : vector<2x16xf32>
    %102 = arith.addf %98, %101 : vector<2x16xf32>
    %103 = arith.addf %87, %102 : vector<2x16xf32>
    %104 = vector.extract_strided_slice %103 {offsets = [0, 0], sizes = [2, 12], strides = [1, 1]} : vector<2x16xf32> to vector<2x12xf32>
    %105 = arith.negf %104 : vector<2x12xf32>
    %106 = math.exp %105 : vector<2x12xf32>
    %cst_11 = arith.constant 1.000000e+00 : f32
    %107 = vector.broadcast %cst_11 : f32 to vector<2x12xf32>
    %108 = arith.addf %107, %106 : vector<2x12xf32>
    %109 = arith.divf %107, %108 : vector<2x12xf32>
    %110 = vector.extract_strided_slice %103 {offsets = [0, 12], sizes = [2, 4], strides = [1, 1]} : vector<2x16xf32> to vector<2x4xf32>
    %111 = math.tanh %110 : vector<2x4xf32>
    %112 = vector.extract_strided_slice %109 {offsets = [0, 4], sizes = [2, 4], strides = [1, 1]} : vector<2x12xf32> to vector<2x4xf32>
    %113 = arith.mulf %112, %83 : vector<2x4xf32>
    %114 = vector.extract_strided_slice %109 {offsets = [0, 0], sizes = [2, 4], strides = [1, 1]} : vector<2x12xf32> to vector<2x4xf32>
    %115 = arith.mulf %114, %111 : vector<2x4xf32>
    %116 = arith.addf %113, %115 : vector<2x4xf32>
    %117 = vector.extract_strided_slice %109 {offsets = [0, 8], sizes = [2, 4], strides = [1, 1]} : vector<2x12xf32> to vector<2x4xf32>
    %118 = math.tanh %116 : vector<2x4xf32>
    %119 = arith.mulf %117, %118 : vector<2x4xf32>
    %120 = vector.extract_strided_slice %5 {offsets = [6, 0], sizes = [2, 16], strides = [1, 1]} : vector<16x16xf32> to vector<2x16xf32>
    %121 = vector.extract_strided_slice %119 {offsets = [0, 0], sizes = [2, 1], strides = [1, 1]} : vector<2x4xf32> to vector<2x1xf32>
    %122 = vector.broadcast %121 : vector<2x1xf32> to vector<2x16xf32>
    %123 = arith.mulf %122, %9 : vector<2x16xf32>
    %124 = vector.extract_strided_slice %119 {offsets = [0, 1], sizes = [2, 1], strides = [1, 1]} : vector<2x4xf32> to vector<2x1xf32>
    %125 = vector.broadcast %124 : vector<2x1xf32> to vector<2x16xf32>
    %126 = arith.mulf %125, %12 : vector<2x16xf32>
    %127 = arith.addf %123, %126 : vector<2x16xf32>
    %128 = vector.extract_strided_slice %119 {offsets = [0, 2], sizes = [2, 1], strides = [1, 1]} : vector<2x4xf32> to vector<2x1xf32>
    %129 = vector.broadcast %128 : vector<2x1xf32> to vector<2x16xf32>
    %130 = arith.mulf %129, %15 : vector<2x16xf32>
    %131 = arith.addf %127, %130 : vector<2x16xf32>
    %132 = vector.extract_strided_slice %119 {offsets = [0, 3], sizes = [2, 1], strides = [1, 1]} : vector<2x4xf32> to vector<2x1xf32>
    %133 = vector.broadcast %132 : vector<2x1xf32> to vector<2x16xf32>
    %134 = arith.mulf %133, %18 : vector<2x16xf32>
    %135 = arith.addf %131, %134 : vector<2x16xf32>
    %136 = arith.addf %120, %135 : vector<2x16xf32>
    %137 = vector.extract_strided_slice %136 {offsets = [0, 0], sizes = [2, 12], strides = [1, 1]} : vector<2x16xf32> to vector<2x12xf32>
    %138 = arith.negf %137 : vector<2x12xf32>
    %139 = math.exp %138 : vector<2x12xf32>
    %cst_12 = arith.constant 1.000000e+00 : f32
    %140 = vector.broadcast %cst_12 : f32 to vector<2x12xf32>
    %141 = arith.addf %140, %139 : vector<2x12xf32>
    %142 = arith.divf %140, %141 : vector<2x12xf32>
    %143 = vector.extract_strided_slice %136 {offsets = [0, 12], sizes = [2, 4], strides = [1, 1]} : vector<2x16xf32> to vector<2x4xf32>
    %144 = math.tanh %143 : vector<2x4xf32>
    %145 = vector.extract_strided_slice %142 {offsets = [0, 4], sizes = [2, 4], strides = [1, 1]} : vector<2x12xf32> to vector<2x4xf32>
    %146 = arith.mulf %145, %116 : vector<2x4xf32>
    %147 = vector.extract_strided_slice %142 {offsets = [0, 0], sizes = [2, 4], strides = [1, 1]} : vector<2x12xf32> to vector<2x4xf32>
    %148 = arith.mulf %147, %144 : vector<2x4xf32>
    %149 = arith.addf %146, %148 : vector<2x4xf32>
    %150 = vector.extract_strided_slice %142 {offsets = [0, 8], sizes = [2, 4], strides = [1, 1]} : vector<2x12xf32> to vector<2x4xf32>
    %151 = math.tanh %149 : vector<2x4xf32>
    %152 = arith.mulf %150, %151 : vector<2x4xf32>
    %153 = vector.extract_strided_slice %5 {offsets = [8, 0], sizes = [2, 16], strides = [1, 1]} : vector<16x16xf32> to vector<2x16xf32>
    %154 = vector.extract_strided_slice %152 {offsets = [0, 0], sizes = [2, 1], strides = [1, 1]} : vector<2x4xf32> to vector<2x1xf32>
    %155 = vector.broadcast %154 : vector<2x1xf32> to vector<2x16xf32>
    %156 = arith.mulf %155, %9 : vector<2x16xf32>
    %157 = vector.extract_strided_slice %152 {offsets = [0, 1], sizes = [2, 1], strides = [1, 1]} : vector<2x4xf32> to vector<2x1xf32>
    %158 = vector.broadcast %157 : vector<2x1xf32> to vector<2x16xf32>
    %159 = arith.mulf %158, %12 : vector<2x16xf32>
    %160 = arith.addf %156, %159 : vector<2x16xf32>
    %161 = vector.extract_strided_slice %152 {offsets = [0, 2], sizes = [2, 1], strides = [1, 1]} : vector<2x4xf32> to vector<2x1xf32>
    %162 = vector.broadcast %161 : vector<2x1xf32> to vector<2x16xf32>
    %163 = arith.mulf %162, %15 : vector<2x16xf32>
    %164 = arith.addf %160, %163 : vector<2x16xf32>
    %165 = vector.extract_strided_slice %152 {offsets = [0, 3], sizes = [2, 1], strides = [1, 1]} : vector<2x4xf32> to vector<2x1xf32>
    %166 = vector.broadcast %165 : vector<2x1xf32> to vector<2x16xf32>
    %167 = arith.mulf %166, %18 : vector<2x16xf32>
    %168 = arith.addf %164, %167 : vector<2x16xf32>
    %169 = arith.addf %153, %168 : vector<2x16xf32>
    %170 = vector.extract_strided_slice %169 {offsets = [0, 0], sizes = [2, 12], strides = [1, 1]} : vector<2x16xf32> to vector<2x12xf32>
    %171 = arith.negf %170 : vector<2x12xf32>
    %172 = math.exp %171 : vector<2x12xf32>
    %cst_13 = arith.constant 1.000000e+00 : f32
    %173 = vector.broadcast %cst_13 : f32 to vector<2x12xf32>
    %174 = arith.addf %173, %172 : vector<2x12xf32>
    %175 = arith.divf %173, %174 : vector<2x12xf32>
    %176 = vector.extract_strided_slice %169 {offsets = [0, 12], sizes = [2, 4], strides = [1, 1]} : vector<2x16xf32> to vector<2x4xf32>
    %177 = math.tanh %176 : vector<2x4xf32>
    %178 = vector.extract_strided_slice %175 {offsets = [0, 4], sizes = [2, 4], strides = [1, 1]} : vector<2x12xf32> to vector<2x4xf32>
    %179 = arith.mulf %178, %149 : vector<2x4xf32>
    %180 = vector.extract_strided_slice %175 {offsets = [0, 0], sizes = [2, 4], strides = [1, 1]} : vector<2x12xf32> to vector<2x4xf32>
    %181 = arith.mulf %180, %177 : vector<2x4xf32>
    %182 = arith.addf %179, %181 : vector<2x4xf32>
    %183 = vector.extract_strided_slice %175 {offsets = [0, 8], sizes = [2, 4], strides = [1, 1]} : vector<2x12xf32> to vector<2x4xf32>
    %184 = math.tanh %182 : vector<2x4xf32>
    %185 = arith.mulf %183, %184 : vector<2x4xf32>
    %186 = vector.extract_strided_slice %5 {offsets = [10, 0], sizes = [2, 16], strides = [1, 1]} : vector<16x16xf32> to vector<2x16xf32>
    %187 = vector.extract_strided_slice %185 {offsets = [0, 0], sizes = [2, 1], strides = [1, 1]} : vector<2x4xf32> to vector<2x1xf32>
    %188 = vector.broadcast %187 : vector<2x1xf32> to vector<2x16xf32>
    %189 = arith.mulf %188, %9 : vector<2x16xf32>
    %190 = vector.extract_strided_slice %185 {offsets = [0, 1], sizes = [2, 1], strides = [1, 1]} : vector<2x4xf32> to vector<2x1xf32>
    %191 = vector.broadcast %190 : vector<2x1xf32> to vector<2x16xf32>
    %192 = arith.mulf %191, %12 : vector<2x16xf32>
    %193 = arith.addf %189, %192 : vector<2x16xf32>
    %194 = vector.extract_strided_slice %185 {offsets = [0, 2], sizes = [2, 1], strides = [1, 1]} : vector<2x4xf32> to vector<2x1xf32>
    %195 = vector.broadcast %194 : vector<2x1xf32> to vector<2x16xf32>
    %196 = arith.mulf %195, %15 : vector<2x16xf32>
    %197 = arith.addf %193, %196 : vector<2x16xf32>
    %198 = vector.extract_strided_slice %185 {offsets = [0, 3], sizes = [2, 1], strides = [1, 1]} : vector<2x4xf32> to vector<2x1xf32>
    %199 = vector.broadcast %198 : vector<2x1xf32> to vector<2x16xf32>
    %200 = arith.mulf %199, %18 : vector<2x16xf32>
    %201 = arith.addf %197, %200 : vector<2x16xf32>
    %202 = arith.addf %186, %201 : vector<2x16xf32>
    %203 = vector.extract_strided_slice %202 {offsets = [0, 0], sizes = [2, 12], strides = [1, 1]} : vector<2x16xf32> to vector<2x12xf32>
    %204 = arith.negf %203 : vector<2x12xf32>
    %205 = math.exp %204 : vector<2x12xf32>
    %cst_14 = arith.constant 1.000000e+00 : f32
    %206 = vector.broadcast %cst_14 : f32 to vector<2x12xf32>
    %207 = arith.addf %206, %205 : vector<2x12xf32>
    %208 = arith.divf %206, %207 : vector<2x12xf32>
    %209 = vector.extract_strided_slice %202 {offsets = [0, 12], sizes = [2, 4], strides = [1, 1]} : vector<2x16xf32> to vector<2x4xf32>
    %210 = math.tanh %209 : vector<2x4xf32>
    %211 = vector.extract_strided_slice %208 {offsets = [0, 4], sizes = [2, 4], strides = [1, 1]} : vector<2x12xf32> to vector<2x4xf32>
    %212 = arith.mulf %211, %182 : vector<2x4xf32>
    %213 = vector.extract_strided_slice %208 {offsets = [0, 0], sizes = [2, 4], strides = [1, 1]} : vector<2x12xf32> to vector<2x4xf32>
    %214 = arith.mulf %213, %210 : vector<2x4xf32>
    %215 = arith.addf %212, %214 : vector<2x4xf32>
    %216 = vector.extract_strided_slice %208 {offsets = [0, 8], sizes = [2, 4], strides = [1, 1]} : vector<2x12xf32> to vector<2x4xf32>
    %217 = math.tanh %215 : vector<2x4xf32>
    %218 = arith.mulf %216, %217 : vector<2x4xf32>
    %219 = vector.extract_strided_slice %5 {offsets = [12, 0], sizes = [2, 16], strides = [1, 1]} : vector<16x16xf32> to vector<2x16xf32>
    %220 = vector.extract_strided_slice %218 {offsets = [0, 0], sizes = [2, 1], strides = [1, 1]} : vector<2x4xf32> to vector<2x1xf32>
    %221 = vector.broadcast %220 : vector<2x1xf32> to vector<2x16xf32>
    %222 = arith.mulf %221, %9 : vector<2x16xf32>
    %223 = vector.extract_strided_slice %218 {offsets = [0, 1], sizes = [2, 1], strides = [1, 1]} : vector<2x4xf32> to vector<2x1xf32>
    %224 = vector.broadcast %223 : vector<2x1xf32> to vector<2x16xf32>
    %225 = arith.mulf %224, %12 : vector<2x16xf32>
    %226 = arith.addf %222, %225 : vector<2x16xf32>
    %227 = vector.extract_strided_slice %218 {offsets = [0, 2], sizes = [2, 1], strides = [1, 1]} : vector<2x4xf32> to vector<2x1xf32>
    %228 = vector.broadcast %227 : vector<2x1xf32> to vector<2x16xf32>
    %229 = arith.mulf %228, %15 : vector<2x16xf32>
    %230 = arith.addf %226, %229 : vector<2x16xf32>
    %231 = vector.extract_strided_slice %218 {offsets = [0, 3], sizes = [2, 1], strides = [1, 1]} : vector<2x4xf32> to vector<2x1xf32>
    %232 = vector.broadcast %231 : vector<2x1xf32> to vector<2x16xf32>
    %233 = arith.mulf %232, %18 : vector<2x16xf32>
    %234 = arith.addf %230, %233 : vector<2x16xf32>
    %235 = arith.addf %219, %234 : vector<2x16xf32>
    %236 = vector.extract_strided_slice %235 {offsets = [0, 0], sizes = [2, 12], strides = [1, 1]} : vector<2x16xf32> to vector<2x12xf32>
    %237 = arith.negf %236 : vector<2x12xf32>
    %238 = math.exp %237 : vector<2x12xf32>
    %cst_15 = arith.constant 1.000000e+00 : f32
    %239 = vector.broadcast %cst_15 : f32 to vector<2x12xf32>
    %240 = arith.addf %239, %238 : vector<2x12xf32>
    %241 = arith.divf %239, %240 : vector<2x12xf32>
    %242 = vector.extract_strided_slice %235 {offsets = [0, 12], sizes = [2, 4], strides = [1, 1]} : vector<2x16xf32> to vector<2x4xf32>
    %243 = math.tanh %242 : vector<2x4xf32>
    %244 = vector.extract_strided_slice %241 {offsets = [0, 4], sizes = [2, 4], strides = [1, 1]} : vector<2x12xf32> to vector<2x4xf32>
    %245 = arith.mulf %244, %215 : vector<2x4xf32>
    %246 = vector.extract_strided_slice %241 {offsets = [0, 0], sizes = [2, 4], strides = [1, 1]} : vector<2x12xf32> to vector<2x4xf32>
    %247 = arith.mulf %246, %243 : vector<2x4xf32>
    %248 = arith.addf %245, %247 : vector<2x4xf32>
    %249 = vector.extract_strided_slice %241 {offsets = [0, 8], sizes = [2, 4], strides = [1, 1]} : vector<2x12xf32> to vector<2x4xf32>
    %250 = math.tanh %248 : vector<2x4xf32>
    %251 = arith.mulf %249, %250 : vector<2x4xf32>
    %252 = vector.extract_strided_slice %5 {offsets = [14, 0], sizes = [2, 16], strides = [1, 1]} : vector<16x16xf32> to vector<2x16xf32>
    %253 = vector.extract_strided_slice %251 {offsets = [0, 0], sizes = [2, 1], strides = [1, 1]} : vector<2x4xf32> to vector<2x1xf32>
    %254 = vector.broadcast %253 : vector<2x1xf32> to vector<2x16xf32>
    %255 = arith.mulf %254, %9 : vector<2x16xf32>
    %256 = vector.extract_strided_slice %251 {offsets = [0, 1], sizes = [2, 1], strides = [1, 1]} : vector<2x4xf32> to vector<2x1xf32>
    %257 = vector.broadcast %256 : vector<2x1xf32> to vector<2x16xf32>
    %258 = arith.mulf %257, %12 : vector<2x16xf32>
    %259 = arith.addf %255, %258 : vector<2x16xf32>
    %260 = vector.extract_strided_slice %251 {offsets = [0, 2], sizes = [2, 1], strides = [1, 1]} : vector<2x4xf32> to vector<2x1xf32>
    %261 = vector.broadcast %260 : vector<2x1xf32> to vector<2x16xf32>
    %262 = arith.mulf %261, %15 : vector<2x16xf32>
    %263 = arith.addf %259, %262 : vector<2x16xf32>
    %264 = vector.extract_strided_slice %251 {offsets = [0, 3], sizes = [2, 1], strides = [1, 1]} : vector<2x4xf32> to vector<2x1xf32>
    %265 = vector.broadcast %264 : vector<2x1xf32> to vector<2x16xf32>
    %266 = arith.mulf %265, %18 : vector<2x16xf32>
    %267 = arith.addf %263, %266 : vector<2x16xf32>
    %268 = arith.addf %252, %267 : vector<2x16xf32>
    %269 = vector.extract_strided_slice %268 {offsets = [0, 0], sizes = [2, 12], strides = [1, 1]} : vector<2x16xf32> to vector<2x12xf32>
    %270 = arith.negf %269 : vector<2x12xf32>
    %271 = math.exp %270 : vector<2x12xf32>
    %cst_16 = arith.constant 1.000000e+00 : f32
    %272 = vector.broadcast %cst_16 : f32 to vector<2x12xf32>
    %273 = arith.addf %272, %271 : vector<2x12xf32>
    %274 = arith.divf %272, %273 : vector<2x12xf32>
    %275 = vector.extract_strided_slice %268 {offsets = [0, 12], sizes = [2, 4], strides = [1, 1]} : vector<2x16xf32> to vector<2x4xf32>
    %276 = math.tanh %275 : vector<2x4xf32>
    %277 = vector.extract_strided_slice %274 {offsets = [0, 4], sizes = [2, 4], strides = [1, 1]} : vector<2x12xf32> to vector<2x4xf32>
    %278 = arith.mulf %277, %248 : vector<2x4xf32>
    %279 = vector.extract_strided_slice %274 {offsets = [0, 0], sizes = [2, 4], strides = [1, 1]} : vector<2x12xf32> to vector<2x4xf32>
    %280 = arith.mulf %279, %276 : vector<2x4xf32>
    %281 = arith.addf %278, %280 : vector<2x4xf32>
    %282 = vector.extract_strided_slice %274 {offsets = [0, 8], sizes = [2, 4], strides = [1, 1]} : vector<2x12xf32> to vector<2x4xf32>
    %283 = math.tanh %281 : vector<2x4xf32>
    %284 = arith.mulf %282, %283 : vector<2x4xf32>
    %c0_17 = arith.constant 0 : index
    %c0_18 = arith.constant 0 : index
    %285 = vector.load %arg4[%c0_17, %c0_18] : memref<4x2xf32, #tpu.memory_space<vmem>>, vector<4x2xf32>
    %cst_19 = arith.constant dense<0.000000e+00> : vector<2x2xf32>
    %286 = tpu.matmul %284, %285, %cst_19 {dimension_numbers = #tpu.dot_dimension_numbers<[1], [0], [0], [1], [0, 0, 1, 1], [], []>} : vector<2x4xf32>, vector<4x2xf32>, vector<2x2xf32> -> vector<2x2xf32>
    %c0_20 = arith.constant 0 : index
    %c0_21 = arith.constant 0 : index
    %287 = vector.load %arg5[%c0_20, %c0_21] : memref<1x2xf32, #tpu.memory_space<vmem>>, vector<1x2xf32>
    %288 = vector.broadcast %287 : vector<1x2xf32> to vector<2x2xf32>
    %289 = arith.addf %286, %288 : vector<2x2xf32>
    %c0_22 = arith.constant 0 : index
    %c0_23 = arith.constant 0 : index
    %290 = vector.load %arg6[%c0_22, %c0_23] : memref<2x2xf32, #tpu.memory_space<vmem>>, vector<2x2xf32>
    tpu.vector_store %arg6[%c0_22, %c0_23], %289 {strides = array<i32>} : memref<2x2xf32, #tpu.memory_space<vmem>>, vector<2x2xf32>,
    return
  }
}

</mosaic_0001>

<bundles_post_ra>
// kernel: tpu_custom_call.1
= control target key start
LH: loop header
LB: loop body
LE: loop exit
PB: predicated region body
PF: predicated region fallthrough
CT: control target
= control target key end

     0   :  { %11 = vsyncpa [#allocation3], 0  ;;  %s1097_s0 = inlined_call_operand.hbm [shape: f32[16,16], index: 0, kind: input, shape index: {}]   ;;  %s1098_s1 = inlined_call_operand.hbm [shape: f32[16,16], index: 1, kind: input, shape index: {}]   ;;  %s1099_s2 = inlined_call_operand.vmem [shape: f32[4,16], index: 2, kind: input, shape index: {}]   ;;  %s1100_s3 = inlined_call_operand.vmem [shape: f32[1,16], index: 3, kind: input, shape index: {}]   ;;  %s1101_s4 = inlined_call_operand.vmem [shape: f32[4,2], index: 4, kind: input, shape index: {}]   ;;  %s1102_s5 = inlined_call_operand.vmem [shape: f32[1,2], index: 5, kind: input, shape index: {}]   ;;  %s1103_s6 = inlined_call_operand.hbm [shape: f32[2,2], index: 6, kind: output, shape index: {}]  }
   0x1   :  { %12 = vsyncpa [#allocation6], 0 }
   0x2   :  { %13 = vsyncpa [#allocation4], 0  ;;  %s898_s21 = smov [#allocation2]   ;;  %s826_s25 = scalar_lea.hbm %s1097_s0, 256 }
   0x3   :  { %s19_s22 = sshll.u32 %s898_s21, 4  ;;  %p827_p0 = scmp.ne.s32.totalorder %s1097_s0, %s826_s25  ;;  %s20_s22 = int_to_ptr.vmem [resolvable:$true] %s19_s22 }
   0x4   :  { %p830_p1 = scmp.lt.u32.totalorder %s826_s25, %s1097_s0 }
   0x6   :  { %p832_p2 = pnand %p830_p1, %p827_p0 }
   0x8   :  { %835 = shalt.err (!%p832_p2)
}
   0x9   :  { %s836_s30 = scalar_lea.vmem %s20_s22, 256  ;;  %p841_p4 = scmp.lt.s32.totalorder %s20_s22, %s20_s22 }
   0xa   :  { %p837_p3 = scmp.ne.s32.totalorder %s20_s22, %s836_s30  ;;  %p842_p5 = scmp.lt.s32.totalorder %s836_s30, %s836_s30 }
   0xc   :  { %p843_p6 = por %p842_p5, %p841_p4 }
   0xe   :  { %p844_p7 = pnand %p843_p6, %p837_p3 }
  0x10   :  { %847 = shalt.err (!%p844_p7)
}
  0x11   :  { %s899_s7 = smov 128   ;;  %s900_s8 = smov 8  }
  0x12   :  { %25 = dma.hbm_to_vmem [thread:$0]  %s1097_s0, 256, %s20_s22, [#allocation3], %s899_s7, %s899_s7, %s900_s8  }
  0x13   :  { %s901_s11 = smov [#allocation5]   ;;  %s848_s15 = scalar_lea.hbm %s1098_s1, 256 }
  0x14   :  { %s31_s12 = sshll.u32 %s901_s11, 4  ;;  %p849_p8 = scmp.ne.s32.totalorder %s1098_s1, %s848_s15  ;;  %s32_s12 = int_to_ptr.vmem [resolvable:$true] %s31_s12 }
  0x15   :  { %p852_p9 = scmp.lt.u32.totalorder %s848_s15, %s1098_s1 }
  0x17   :  { %p854_p10 = pnand %p852_p9, %p849_p8 }
  0x19   :  { %857 = shalt.err (!%p854_p10)
}
  0x1a   :  { %s858_s20 = scalar_lea.vmem %s32_s12, 256  ;;  %p863_p12 = scmp.lt.s32.totalorder %s32_s12, %s32_s12 }
  0x1b   :  { %p859_p11 = scmp.ne.s32.totalorder %s32_s12, %s858_s20  ;;  %p864_p13 = scmp.lt.s32.totalorder %s858_s20, %s858_s20 }
  0x1d   :  { %p865_p0 = por %p864_p13, %p863_p12 }
  0x1f   :  { %p866_p1 = pnand %p865_p0, %p859_p11 }
  0x21   :  { %869 = shalt.err (!%p866_p1)
}
  0x22   :  { %37 = dma.hbm_to_vmem [thread:$0]  %s1098_s1, 256, %s32_s12, [#allocation6], %s899_s7, %s899_s7, %s900_s8  }
  0x23   :  { %892 = dma.done.wait [#allocation3], 256  }
  0x24   :  { %893 = vsyncadd [#allocation3], 4294967040 }
  0x25   :  { %894 = dma.done.wait [#allocation6], 256  }
  0x26   :  { %895 = vsyncadd [#allocation6], 4294967040  ;;  %vm63_vm0 = vcmask 130048   ;;  %v54_v0 = vld [vmem:[#allocation5] sm:$0xff]  ;;  %v55_v1 = vld [vmem:[#allocation5 + $0x8] sm:$0xff]  ;;  %v146_v5 = vlaneseq  ;;  %s902_s24 = smov 116  }
  0x27   :  { %v52_v2 = vld [vmem:[#allocation2] sm:$0xff]  ;;  %v718_v3 = vpack.c.bf16 %v55_v1, %v54_v0  ;;  %v53_v4 = vld [vmem:[#allocation2 + $0x8] sm:$0xff]  ;;  %v904_v39 = vmov 9   ;;  %v905_v40 = vmov 8   ;;  %v906_v44 = vmov 10   ;;  %s910_s27 = smov 120  }
  0x28   :  { %710 = vmatprep.mubr.msk.f32.mxu0 %vm63_vm0, %v52_v2  ;;  %v147_v6 = vshrl.u32 %v146_v5, 7  ;;  %v145_v9 = vld [vmem:[%s1099_s2] sm:$0xf]  ;;  %737 = vset.pattern.permute.xlu0 %v904_v39  ;;  %v907_v45 = vmov 11   ;;  %vm594_vm1 = vcmask 1043456   ;;  %vm909_vm2 = vmmov 0  }
  0x29   :  { %719 = vmatprep.subr.bf16.mxu0 %v718_v3  ;;  %v686_v22 = vld [vmem:[%s1100_s3] ss:$0 sm:$0xff]  ;;  %s903_s3 = smov 4   ;;  %736 = vset.pattern.permute.xlu1 %v905_v40  ;;  %vm591_vm3 = vcmask 31744   ;;  %vm668_vm4 = vcmask 9216  }
  0x2a   :  { %721 = vmatpush3.bf16.msra.mxu0 %v718_v3  ;;  %v148_v7 = vsub.s32 0, %v147_v6  ;;  %v152_v8 = vsub.s32 1, %v147_v6  ;;  %v156_v12 = vsub.s32 2, %v147_v6  ;;  %v160_v14 = vsub.s32 3, %v147_v6 }
  0x2c   :  { %v974_v10 = vrot.slane %v145_v9, %v148_v7  ;;  %v976_v11 = vrot.slane %v145_v9, %v152_v8  ;;  %v978_v13 = vrot.slane %v145_v9, %v156_v12  ;;  %v982_v17 = vrot.slane %v145_v9, %v160_v14 }
  0x2d   :  { %711 = vmatmul.mubr.msk.f32.vlgmr.msra.gmra.mrb[0].mxu0 %vm63_vm0, %v53_v4 }
  0x2e   :  { %v162_v15 = vmul.f32 0.0, %v974_v10  ;;  %v163_v16 = vmul.f32 0.0, %v976_v11  ;;  %v165_v19 = vmul.f32 0.0, %v978_v13  ;;  %v167_v21 = vmul.f32 0.0, %v982_v17 }
  0x30   :  { %v164_v18 = vadd.f32 %v163_v16, %v162_v15 }
  0x32   :  { %v166_v20 = vadd.f32 %v165_v19, %v164_v18 }
  0x34   :  { %v168_v24 = vadd.f32 %v167_v21, %v166_v20 }
 0x100   :  { %v712_v23 = vpop.f32.mrb[0].mxu0 }
 0x101   :  { %v989_v25 = vadd.f32 %v712_v23, %v686_v22  ;;  %v136_v26 = vpop.f32.mrb[1].mxu0 }
 0x102   :  { %v991_v27 = vadd.f32 %v686_v22, %v136_v26 }
 0x104   :  { %v169_v28 = vadd.f32 %v168_v24, %v991_v27 }
 0x106   :  { %762 = vtanh.f32 %v169_v28  ;;  %v689_v30 = vmul.f32 -1.442695, %v169_v28 }
 0x108   :  { %764 = vpow2.f32 %v689_v30 }
 0x110   :  { %v763_v29 = vpop.eup %762 }
 0x111   :  { %179 = vrot.lane.b32.xlu0 %v763_v29, %s902_s24 }
 0x112   :  { %v765_v31 = vpop.eup %764 }
 0x113   :  { %v173_v32 = vadd.f32 1.0, %v765_v31 }
 0x115   :  { %766 = vrcp.f32 %v173_v32 }
 0x11f   :  { %v767_v33 = vpop.eup %766 }
 0x120   :  { %v177_v36 = vmul.f32 0.0, %v767_v33 }
 0x183   :  { %v180_v34 = vpop.permute.xlu0 %179 }
 0x184   :  { %v182_v35 = vmul.f32 %v767_v33, %v180_v34 }
 0x186   :  { %184 = vrot.lane.b32.xlu0 %v182_v35, %s903_s3 }
 0x1f8   :  { %v185_v37 = vpop.permute.xlu0 %184 }
 0x1f9   :  { %v187_v38 = vadd.f32 %v185_v37, %v177_v36 }
 0x1fb   :  { %768 = vtanh.f32 %v187_v38  ;;  %v230_v2 = vrot.slane %v187_v38, 6 }
 0x205   :  { %v769_v41 = vpop.eup %768 }
 0x206   :  { %190 = vrot.lane.b32.xlu1 %v769_v41, %s903_s3 }
 0x278   :  { %v191_v42 = vpop.permute.xlu1 %190 }
 0x279   :  { %v193_v43 = vmul.f32 %v767_v33, %v191_v42 }
 0x27b   :  { %201 = vperm.xlu0 %737, %v193_v43   ;;  %196 = vperm.xlu1 %736, %v193_v43  }
 0x27f   :  { %738 = vset.pattern.permute.xlu1 %v906_v44 }
 0x280   :  { %207 = vperm.xlu1 %738, %v193_v43  }
 0x284   :  { %739 = vset.pattern.permute.xlu1 %v907_v45 }
 0x285   :  { %213 = vperm.xlu1 %739, %v193_v43  }
 0x289   :  { %740 = vset.pattern.permute.xlu1 %v905_v40 }
 0x2fa   :  { %v197_v46 = vpop.permute.xlu1 %196  ;;  %v202_v47 = vpop.permute.xlu0 %201 }
 0x2fb   :  { %v204_v48 = vmul.f32 %v202_v47, %v976_v11  ;;  %v199_v49 = vmul.f32 %v197_v46, %v974_v10 }
 0x2fd   :  { %v205_v52 = vadd.f32 %v204_v48, %v199_v49 }
 0x2ff   :  { %v208_v50 = vpop.permute.xlu1 %207 }
 0x300   :  { %v210_v51 = vmul.f32 %v208_v50, %v978_v13 }
 0x302   :  { %v211_v54 = vadd.f32 %v210_v51, %v205_v52 }
 0x304   :  { %v214_v53 = vpop.permute.xlu1 %213 }
 0x305   :  { %v216_v55 = vmul.f32 %v214_v53, %v982_v17 }
 0x307   :  { %v217_v56 = vadd.f32 %v216_v55, %v211_v54 }
 0x309   :  { %v219_v57 = vrot.slane %v217_v56, 6 }
 0x30b   :  { %v221_v58 = vadd.f32 %v219_v57, %v991_v27 }
 0x30d   :  { %770 = vtanh.f32 %v221_v58  ;;  %v690_v60 = vmul.f32 -1.442695, %v221_v58 }
 0x30f   :  { %772 = vpow2.f32 %v690_v60 }
 0x317   :  { %v771_v59 = vpop.eup %770 }
 0x318   :  { %234 = vrot.lane.b32.xlu0 %v771_v59, %s902_s24 }
 0x319   :  { %v773_v61 = vpop.eup %772 }
 0x31a   :  { %v225_v62 = vadd.f32 1.0, %v773_v61 }
 0x31c   :  { %774 = vrcp.f32 %v225_v62 }
 0x326   :  { %v775_v63 = vpop.eup %774 }
 0x327   :  { %v232_v3 = vmul.f32 %v775_v63, %v230_v2 }
 0x38a   :  { %v235_v0 = vpop.permute.xlu0 %234 }
 0x38b   :  { %v237_v1 = vmul.f32 %v775_v63, %v235_v0 }
 0x38d   :  { %239 = vrot.lane.b32.xlu1 %v237_v1, %s903_s3 }
 0x3ff   :  { %v240_v4 = vpop.permute.xlu1 %239 }
 0x400   :  { %v242_v5 = vadd.f32 %v240_v4, %v232_v3 }
 0x402   :  { %776 = vtanh.f32 %v242_v5  ;;  %v285_v35 = vrot.slane %v242_v5, 6 }
 0x40c   :  { %v777_v6 = vpop.eup %776 }
 0x40d   :  { %245 = vrot.lane.b32.xlu0 %v777_v6, %s903_s3 }
 0x47f   :  { %v246_v7 = vpop.permute.xlu0 %245 }
 0x480   :  { %v248_v8 = vmul.f32 %v775_v63, %v246_v7 }
 0x482   :  { %256 = vperm.xlu0 %737, %v248_v8   ;;  %251 = vperm.xlu1 %740, %v248_v8  }
 0x486   :  { %742 = vset.pattern.permute.xlu0 %v907_v45  ;;  %741 = vset.pattern.permute.xlu1 %v906_v44 }
 0x487   :  { %268 = vperm.xlu0 %742, %v248_v8   ;;  %262 = vperm.xlu1 %741, %v248_v8  }
 0x48b   :  { %744 = vset.pattern.permute.xlu0 %v904_v39  ;;  %743 = vset.pattern.permute.xlu1 %v905_v40 }
 0x501   :  { %v257_v9 = vpop.permute.xlu0 %256  ;;  %v252_v12 = vpop.permute.xlu1 %251 }
 0x502   :  { %v259_v14 = vmul.f32 %v257_v9, %v976_v11  ;;  %v254_v15 = vmul.f32 %v252_v12, %v974_v10 }
 0x504   :  { %v260_v19 = vadd.f32 %v259_v14, %v254_v15 }
 0x506   :  { %v269_v16 = vpop.permute.xlu0 %268  ;;  %v263_v18 = vpop.permute.xlu1 %262 }
 0x507   :  { %v265_v20 = vmul.f32 %v263_v18, %v978_v13  ;;  %v271_v21 = vmul.f32 %v269_v16, %v982_v17 }
 0x509   :  { %v266_v22 = vadd.f32 %v265_v20, %v260_v19 }
 0x50b   :  { %v272_v23 = vadd.f32 %v271_v21, %v266_v22 }
 0x50d   :  { %v274_v24 = vrot.slane %v272_v23, 6 }
 0x50f   :  { %v276_v26 = vadd.f32 %v274_v24, %v991_v27 }
 0x511   :  { %778 = vtanh.f32 %v276_v26  ;;  %v691_v29 = vmul.f32 -1.442695, %v276_v26 }
 0x513   :  { %780 = vpow2.f32 %v691_v29 }
 0x51b   :  { %v779_v28 = vpop.eup %778 }
 0x51c   :  { %289 = vrot.lane.b32.xlu1 %v779_v28, %s902_s24 }
 0x51d   :  { %v781_v30 = vpop.eup %780 }
 0x51e   :  { %v280_v31 = vadd.f32 1.0, %v781_v30 }
 0x520   :  { %782 = vrcp.f32 %v280_v31 }
 0x52a   :  { %v783_v32 = vpop.eup %782 }
 0x52b   :  { %v287_v36 = vmul.f32 %v783_v32, %v285_v35 }
 0x58e   :  { %v290_v33 = vpop.permute.xlu1 %289 }
 0x58f   :  { %v292_v34 = vmul.f32 %v783_v32, %v290_v33 }
 0x591   :  { %294 = vrot.lane.b32.xlu1 %v292_v34, %s903_s3 }
 0x603   :  { %v295_v37 = vpop.permute.xlu1 %294 }
 0x604   :  { %v297_v38 = vadd.f32 %v295_v37, %v287_v36 }
 0x606   :  { %784 = vtanh.f32 %v297_v38  ;;  %v340_v2 = vrot.slane %v297_v38, 6 }
 0x610   :  { %v785_v41 = vpop.eup %784 }
 0x611   :  { %300 = vrot.lane.b32.xlu0 %v785_v41, %s903_s3 }
 0x683   :  { %v301_v42 = vpop.permute.xlu0 %300 }
 0x684   :  { %v303_v43 = vmul.f32 %v783_v32, %v301_v42 }
 0x686   :  { %311 = vperm.xlu0 %744, %v303_v43   ;;  %306 = vperm.xlu1 %743, %v303_v43  }
 0x68a   :  { %745 = vset.pattern.permute.xlu1 %v906_v44 }
 0x68b   :  { %317 = vperm.xlu1 %745, %v303_v43  }
 0x68f   :  { %746 = vset.pattern.permute.xlu1 %v907_v45 }
 0x690   :  { %323 = vperm.xlu1 %746, %v303_v43  }
 0x694   :  { %747 = vset.pattern.permute.xlu1 %v905_v40 }
 0x705   :  { %v307_v46 = vpop.permute.xlu1 %306  ;;  %v312_v47 = vpop.permute.xlu0 %311 }
 0x706   :  { %v314_v48 = vmul.f32 %v312_v47, %v976_v11  ;;  %v309_v49 = vmul.f32 %v307_v46, %v974_v10 }
 0x708   :  { %v315_v52 = vadd.f32 %v314_v48, %v309_v49 }
 0x70a   :  { %v318_v50 = vpop.permute.xlu1 %317 }
 0x70b   :  { %v320_v51 = vmul.f32 %v318_v50, %v978_v13 }
 0x70d   :  { %v321_v54 = vadd.f32 %v320_v51, %v315_v52 }
 0x70f   :  { %v324_v53 = vpop.permute.xlu1 %323 }
 0x710   :  { %v326_v55 = vmul.f32 %v324_v53, %v982_v17 }
 0x712   :  { %v327_v56 = vadd.f32 %v326_v55, %v321_v54 }
 0x714   :  { %v329_v57 = vrot.slane %v327_v56, 6 }
 0x716   :  { %v331_v58 = vadd.f32 %v329_v57, %v991_v27 }
 0x718   :  { %786 = vtanh.f32 %v331_v58  ;;  %v692_v60 = vmul.f32 -1.442695, %v331_v58 }
 0x71a   :  { %788 = vpow2.f32 %v692_v60 }
 0x722   :  { %v787_v59 = vpop.eup %786 }
 0x723   :  { %344 = vrot.lane.b32.xlu0 %v787_v59, %s902_s24 }
 0x724   :  { %v789_v61 = vpop.eup %788 }
 0x725   :  { %v335_v62 = vadd.f32 1.0, %v789_v61 }
 0x727   :  { %790 = vrcp.f32 %v335_v62 }
 0x731   :  { %v791_v63 = vpop.eup %790 }
 0x732   :  { %v342_v3 = vmul.f32 %v791_v63, %v340_v2 }
 0x795   :  { %v345_v0 = vpop.permute.xlu0 %344 }
 0x796   :  { %v347_v1 = vmul.f32 %v791_v63, %v345_v0 }
 0x798   :  { %349 = vrot.lane.b32.xlu1 %v347_v1, %s903_s3 }
 0x80a   :  { %v350_v4 = vpop.permute.xlu1 %349 }
 0x80b   :  { %v352_v5 = vadd.f32 %v350_v4, %v342_v3 }
 0x80d   :  { %792 = vtanh.f32 %v352_v5  ;;  %v395_v34 = vrot.slane %v352_v5, 6 }
 0x817   :  { %v793_v27 = vpop.eup %792 }
 0x818   :  { %355 = vrot.lane.b32.xlu0 %v793_v27, %s903_s3 }
 0x88a   :  { %v356_v6 = vpop.permute.xlu0 %355 }
 0x88b   :  { %v358_v7 = vmul.f32 %v791_v63, %v356_v6 }
 0x88d   :  { %366 = vperm.xlu0 %744, %v358_v7   ;;  %361 = vperm.xlu1 %747, %v358_v7  }
 0x891   :  { %749 = vset.pattern.permute.xlu0 %v907_v45  ;;  %748 = vset.pattern.permute.xlu1 %v906_v44 }
 0x892   :  { %378 = vperm.xlu0 %749, %v358_v7   ;;  %372 = vperm.xlu1 %748, %v358_v7  }
 0x896   :  { %751 = vset.pattern.permute.xlu0 %v904_v39  ;;  %750 = vset.pattern.permute.xlu1 %v905_v40 }
 0x90c   :  { %v367_v8 = vpop.permute.xlu0 %366  ;;  %v362_v9 = vpop.permute.xlu1 %361 }
 0x90d   :  { %v369_v12 = vmul.f32 %v367_v8, %v976_v11  ;;  %v364_v14 = vmul.f32 %v362_v9, %v974_v10 }
 0x90f   :  { %v370_v18 = vadd.f32 %v369_v12, %v364_v14 }
 0x911   :  { %v379_v15 = vpop.permute.xlu0 %378  ;;  %v373_v16 = vpop.permute.xlu1 %372 }
 0x912   :  { %v375_v19 = vmul.f32 %v373_v16, %v978_v13  ;;  %v381_v20 = vmul.f32 %v379_v15, %v982_v17 }
 0x914   :  { %v376_v21 = vadd.f32 %v375_v19, %v370_v18 }
 0x916   :  { %v382_v22 = vadd.f32 %v381_v20, %v376_v21 }
 0x918   :  { %v384_v23 = vrot.slane %v382_v22, 6 }
 0x91a   :  { %v386_v24 = vadd.f32 %v384_v23, %v989_v25 }
 0x91c   :  { %794 = vtanh.f32 %v386_v24  ;;  %v693_v28 = vmul.f32 -1.442695, %v386_v24 }
 0x91e   :  { %796 = vpow2.f32 %v693_v28 }
 0x926   :  { %v795_v26 = vpop.eup %794 }
 0x927   :  { %399 = vrot.lane.b32.xlu1 %v795_v26, %s902_s24 }
 0x928   :  { %v797_v29 = vpop.eup %796 }
 0x929   :  { %v390_v30 = vadd.f32 1.0, %v797_v29 }
 0x92b   :  { %798 = vrcp.f32 %v390_v30 }
 0x935   :  { %v799_v31 = vpop.eup %798 }
 0x936   :  { %v397_v35 = vmul.f32 %v799_v31, %v395_v34 }
 0x999   :  { %v400_v32 = vpop.permute.xlu1 %399 }
 0x99a   :  { %v402_v33 = vmul.f32 %v799_v31, %v400_v32 }
 0x99c   :  { %404 = vrot.lane.b32.xlu1 %v402_v33, %s903_s3 }
 0xa0e   :  { %v405_v36 = vpop.permute.xlu1 %404 }
 0xa0f   :  { %v407_v37 = vadd.f32 %v405_v36, %v397_v35 }
 0xa11   :  { %800 = vtanh.f32 %v407_v37  ;;  %v450_v1 = vrot.slane %v407_v37, 6 }
 0xa1b   :  { %v801_v38 = vpop.eup %800 }
 0xa1c   :  { %410 = vrot.lane.b32.xlu0 %v801_v38, %s903_s3 }
 0xa8e   :  { %v411_v41 = vpop.permute.xlu0 %410 }
 0xa8f   :  { %v413_v42 = vmul.f32 %v799_v31, %v411_v41 }
 0xa91   :  { %421 = vperm.xlu0 %751, %v413_v42   ;;  %416 = vperm.xlu1 %750, %v413_v42  }
 0xa95   :  { %752 = vset.pattern.permute.xlu1 %v906_v44 }
 0xa96   :  { %427 = vperm.xlu1 %752, %v413_v42  }
 0xa9a   :  { %753 = vset.pattern.permute.xlu1 %v907_v45 }
 0xa9b   :  { %433 = vperm.xlu1 %753, %v413_v42  }
 0xa9f   :  { %754 = vset.pattern.permute.xlu1 %v905_v40 }
 0xb10   :  { %v417_v43 = vpop.permute.xlu1 %416  ;;  %v422_v46 = vpop.permute.xlu0 %421 }
 0xb11   :  { %v424_v47 = vmul.f32 %v422_v46, %v976_v11  ;;  %v419_v48 = vmul.f32 %v417_v43, %v974_v10 }
 0xb13   :  { %v425_v51 = vadd.f32 %v424_v47, %v419_v48 }
 0xb15   :  { %v428_v49 = vpop.permute.xlu1 %427 }
 0xb16   :  { %v430_v50 = vmul.f32 %v428_v49, %v978_v13 }
 0xb18   :  { %v431_v53 = vadd.f32 %v430_v50, %v425_v51 }
 0xb1a   :  { %v434_v52 = vpop.permute.xlu1 %433 }
 0xb1b   :  { %v436_v54 = vmul.f32 %v434_v52, %v982_v17 }
 0xb1d   :  { %v437_v55 = vadd.f32 %v436_v54, %v431_v53 }
 0xb1f   :  { %v439_v56 = vrot.slane %v437_v55, 6 }
 0xb21   :  { %v441_v57 = vadd.f32 %v439_v56, %v989_v25 }
 0xb23   :  { %802 = vtanh.f32 %v441_v57  ;;  %v694_v59 = vmul.f32 -1.442695, %v441_v57 }
 0xb25   :  { %804 = vpow2.f32 %v694_v59 }
 0xb2d   :  { %v803_v58 = vpop.eup %802 }
 0xb2e   :  { %454 = vrot.lane.b32.xlu0 %v803_v58, %s902_s24 }
 0xb2f   :  { %v805_v60 = vpop.eup %804 }
 0xb30   :  { %v445_v61 = vadd.f32 1.0, %v805_v60  ;;  %v908_v60 = vmov 0.0  }
 0xb31   :  { %713 = vmatprep.subr.mxu1 %v908_v60  ;;  %715 = vmatprep.mubr.msk.f32.mxu1 %vm909_vm2, %v908_v60 }
 0xb32   :  { %806 = vrcp.f32 %v445_v61 }
 0xb3c   :  { %v807_v62 = vpop.eup %806 }
 0xb3d   :  { %v452_v2 = vmul.f32 %v807_v62, %v450_v1 }
 0xba0   :  { %v455_v63 = vpop.permute.xlu0 %454 }
 0xba1   :  { %v457_v0 = vmul.f32 %v807_v62, %v455_v63 }
 0xba3   :  { %459 = vrot.lane.b32.xlu1 %v457_v0, %s903_s3 }
 0xc15   :  { %v460_v3 = vpop.permute.xlu1 %459 }
 0xc16   :  { %v462_v4 = vadd.f32 %v460_v3, %v452_v2  ;;  %v697_v2 = vld [vmem:[%s1102_s5] ss:$0 sm:$0xff] }
 0xc18   :  { %808 = vtanh.f32 %v462_v4  ;;  %v505_v31 = vrot.slane %v462_v4, 6 }
 0xc22   :  { %v809_v5 = vpop.eup %808 }
 0xc23   :  { %465 = vrot.lane.b32.xlu0 %v809_v5, %s903_s3 }
 0xc95   :  { %v466_v27 = vpop.permute.xlu0 %465 }
 0xc96   :  { %v468_v6 = vmul.f32 %v807_v62, %v466_v27 }
 0xc98   :  { %476 = vperm.xlu0 %751, %v468_v6   ;;  %471 = vperm.xlu1 %754, %v468_v6  }
 0xc9c   :  { %756 = vset.pattern.permute.xlu0 %v907_v45  ;;  %755 = vset.pattern.permute.xlu1 %v906_v44 }
 0xc9d   :  { %488 = vperm.xlu0 %756, %v468_v6   ;;  %482 = vperm.xlu1 %755, %v468_v6  }
 0xca1   :  { %758 = vset.pattern.permute.xlu0 %v904_v39  ;;  %757 = vset.pattern.permute.xlu1 %v905_v40 }
 0xd17   :  { %v477_v7 = vpop.permute.xlu0 %476  ;;  %v472_v8 = vpop.permute.xlu1 %471 }
 0xd18   :  { %v479_v9 = vmul.f32 %v477_v7, %v976_v11  ;;  %v474_v12 = vmul.f32 %v472_v8, %v974_v10 }
 0xd1a   :  { %v480_v16 = vadd.f32 %v479_v9, %v474_v12 }
 0xd1c   :  { %v489_v14 = vpop.permute.xlu0 %488  ;;  %v483_v15 = vpop.permute.xlu1 %482 }
 0xd1d   :  { %v485_v18 = vmul.f32 %v483_v15, %v978_v13  ;;  %v491_v19 = vmul.f32 %v489_v14, %v982_v17 }
 0xd1f   :  { %v486_v20 = vadd.f32 %v485_v18, %v480_v16 }
 0xd21   :  { %v492_v21 = vadd.f32 %v491_v19, %v486_v20 }
 0xd23   :  { %v494_v22 = vrot.slane %v492_v21, 6 }
 0xd25   :  { %v496_v39 = vadd.f32 %v494_v22, %v989_v25 }
 0xd27   :  { %810 = vtanh.f32 %v496_v39  ;;  %v695_v23 = vmul.f32 -1.442695, %v496_v39 }
 0xd29   :  { %812 = vpow2.f32 %v695_v23 }
 0xd31   :  { %v811_v40 = vpop.eup %810 }
 0xd32   :  { %509 = vrot.lane.b32.xlu1 %v811_v40, %s902_s24 }
 0xd33   :  { %v813_v24 = vpop.eup %812 }
 0xd34   :  { %v500_v26 = vadd.f32 1.0, %v813_v24 }
 0xd36   :  { %814 = vrcp.f32 %v500_v26 }
 0xd40   :  { %v815_v28 = vpop.eup %814 }
 0xd41   :  { %v507_v32 = vmul.f32 %v815_v28, %v505_v31 }
 0xda4   :  { %v510_v29 = vpop.permute.xlu1 %509 }
 0xda5   :  { %v512_v30 = vmul.f32 %v815_v28, %v510_v29 }
 0xda7   :  { %514 = vrot.lane.b32.xlu1 %v512_v30, %s903_s3 }
 0xe19   :  { %v515_v33 = vpop.permute.xlu1 %514 }
 0xe1a   :  { %v517_v34 = vadd.f32 %v515_v33, %v507_v32 }
 0xe1c   :  { %816 = vtanh.f32 %v517_v34  ;;  %v560_v57 = vrot.slane %v517_v34, 6 }
 0xe26   :  { %v817_v35 = vpop.eup %816 }
 0xe27   :  { %520 = vrot.lane.b32.xlu0 %v817_v35, %s903_s3 }
 0xe99   :  { %v521_v36 = vpop.permute.xlu0 %520 }
 0xe9a   :  { %v523_v37 = vmul.f32 %v815_v28, %v521_v36 }
 0xe9c   :  { %531 = vperm.xlu0 %758, %v523_v37   ;;  %526 = vperm.xlu1 %757, %v523_v37  }
 0xea0   :  { %759 = vset.pattern.permute.xlu1 %v906_v44  ;;  %761 = vset.pattern.permute.xlu0 %v907_v45 }
 0xea1   :  { %537 = vperm.xlu1 %759, %v523_v37  }
 0xea5   :  { %760 = vset.pattern.permute.xlu1 %v907_v45 }
 0xea6   :  { %543 = vperm.xlu1 %760, %v523_v37  }
 0xf1b   :  { %v527_v38 = vpop.permute.xlu1 %526  ;;  %v532_v41 = vpop.permute.xlu0 %531 }
 0xf1c   :  { %v534_v42 = vmul.f32 %v532_v41, %v976_v11  ;;  %v529_v43 = vmul.f32 %v527_v38, %v974_v10 }
 0xf1e   :  { %v535_v48 = vadd.f32 %v534_v42, %v529_v43 }
 0xf20   :  { %v538_v46 = vpop.permute.xlu1 %537 }
 0xf21   :  { %v540_v47 = vmul.f32 %v538_v46, %v978_v13 }
 0xf23   :  { %v541_v50 = vadd.f32 %v540_v47, %v535_v48 }
 0xf25   :  { %v544_v49 = vpop.permute.xlu1 %543 }
 0xf26   :  { %v546_v44 = vmul.f32 %v544_v49, %v982_v17 }
 0xf28   :  { %v547_v51 = vadd.f32 %v546_v44, %v541_v50 }
 0xf2a   :  { %v549_v52 = vrot.slane %v547_v51, 6 }
 0xf2c   :  { %v551_v53 = vadd.f32 %v549_v52, %v989_v25  ;;  %v579_v25 = vld [vmem:[%s1101_s4] sm:$0xf]  ;;  %s911_s4 = smov [#allocation7]  }
 0xf2d   :  { %714 = vmatpush3.msk.msra.mxu1 %vm594_vm1, %v579_v25  ;;  %s676_s30 = sshll.u32 %s911_s4, 4  ;;  %s677_s30 = int_to_ptr.vmem [resolvable:$true] %s676_s30 }
 0xf2e   :  { %818 = vtanh.f32 %v551_v53  ;;  %v696_v54 = vmul.f32 -1.442695, %v551_v53  ;;  %s870_s7 = scalar_lea.vmem %s677_s30, 32  ;;  %p875_p3 = scmp.lt.s32.totalorder %s677_s30, %s677_s30 }
 0xf2f   :  { %p871_p2 = scmp.ne.s32.totalorder %s677_s30, %s870_s7  ;;  %p876_p4 = scmp.lt.s32.totalorder %s870_s7, %s870_s7 }
 0xf30   :  { %820 = vpow2.f32 %v696_v54 }
 0xf31   :  { %p877_p5 = por %p876_p4, %p875_p3 }
 0xf33   :  { %p878_p6 = pnand %p877_p5, %p871_p2 }
 0xf38   :  { %v819_v45 = vpop.eup %818 }
 0xf39   :  { %564 = vrot.lane.b32.xlu0 %v819_v45, %s902_s24 }
 0xf3a   :  { %v821_v11 = vpop.eup %820 }
 0xf3b   :  { %v555_v10 = vadd.f32 1.0, %v821_v11 }
 0xf3d   :  { %822 = vrcp.f32 %v555_v10 }
 0xf47   :  { %v823_v55 = vpop.eup %822 }
 0xf48   :  { %v562_v17 = vmul.f32 %v823_v55, %v560_v57 }
 0xfab   :  { %v565_v13 = vpop.permute.xlu0 %564 }
 0xfac   :  { %v567_v56 = vmul.f32 %v823_v55, %v565_v13 }
 0xfae   :  { %569 = vrot.lane.b32.xlu1 %v567_v56, %s903_s3 }
0x1020   :  { %v570_v58 = vpop.permute.xlu1 %569 }
0x1021   :  { %v572_v59 = vadd.f32 %v570_v58, %v562_v17 }
0x1023   :  { %824 = vtanh.f32 %v572_v59 }
0x102d   :  { %v825_v61 = vpop.eup %824 }
0x102e   :  { %575 = vrot.lane.b32.xlu0 %v825_v61, %s903_s3 }
0x10a0   :  { %v576_v62 = vpop.permute.xlu0 %575 }
0x10a1   :  { %v578_v63 = vmul.f32 %v823_v55, %v576_v62 }
0x10a3   :  { %v588_v0 = vrot.slane %v578_v63, 6 }
0x10a5   :  { %589 = vrot.lane.b32.xlu1 %v588_v0, %s910_s27 }
0x1117   :  { %v590_v1 = vpop.permute.xlu1 %589 }
0x1118   :  { %716 = vmatmul.mubr.msk.f32.vlgmr.msra.gmra.mrb[0].mxu1 %vm591_vm3, %v590_v1 }
0x11eb   :  { %v664_v3 = vpop.f32.mrb[0].mxu1 }
0x11ec   :  { %v665_v4 = vadd.f32 %v697_v2, %v664_v3  ;;  %v717_v5 = vpop.f32.mrb[1].mxu1 }
0x11ee   :  { %669 = vst.msk [vmem:[#allocation7] sm:$0x3] %vm668_vm4, %v665_v4 }
0x11ef   :  { %881 = shalt.err (!%p878_p6)
}
0x11f0   :  { %s882_s10 = scalar_lea.hbm %s1103_s6, 32 }
0x11f1   :  { %p883_p7 = scmp.ne.s32.totalorder %s1103_s6, %s882_s10  ;;  %p886_p8 = scmp.lt.u32.totalorder %s882_s10, %s1103_s6 }
0x11f3   :  { %p888_p9 = pnand %p886_p8, %p883_p7 }
0x11f5   :  { %891 = shalt.err (!%p888_p9)
}
0x11f6   :  { %679 = dma.vmem_to_hbm [thread:$0]  %s677_s30, 32, %s1103_s6, [#allocation4]  }
0x11f7   :  { %896 = dma.done.wait [#allocation4], 32  }
0x11f8   :  { %897 = vsyncadd [#allocation4], 4294967264 }
0x11f9   :  { %683 = vsyncpa [#allocation3], 1 }
0x11fa   :  { %684 = vsyncpa [#allocation6], 1 }
0x11fb   :  { %685 = vsyncpa [#allocation4], 1 }

</bundles_post_ra>
